<compile_context>
chip_gen: v6e
topology: v6e:2x2x1
jax: 0.10.0
libtpu: 0.0.40
codegen_flags: <defaults>
</compile_context>

<pallas_src>
import jax
import jax.numpy as jnp
from jax.experimental import pallas as pl
from jax.experimental.pallas import tpu as pltpu


def _round_up(x: int, m: int) -> int:
    return ((x + m - 1) // m) * m


def _fused_decoder_kernel(x_ref, w1_ref, b1_ref, w2_ref, b2_ref, o_ref):
    # Linear1 of BOTH decoders (fused along the output dim) + bias + ReLU, in f32.
    h = jnp.dot(x_ref[...], w1_ref[...], preferred_element_type=jnp.float32)
    h = jnp.maximum(h + b1_ref[...], 0.0)
    # Linear2 against the block-diagonal fused W2 -> one lane-dense padded output.
    y = jnp.dot(h.astype(w2_ref.dtype), w2_ref[...],
                preferred_element_type=jnp.float32)
    o_ref[...] = (y + b2_ref[...]).astype(o_ref.dtype)


def fuse_decoder_params(nutr_params, ingr_params, lane_pad=128):
    """Fuse the two (Linear->ReLU->Linear) decoders into a single weight set.

    Returns ((w1cat[D,2D], b1cat[1,2D], w2bd[2D,O_pad], b2cat[1,O_pad]),
             (num_nutrs, num_ingrs)).
    The fused second-layer weight is block-diagonal and zero-padded to a
    lane-dense output width O_pad (multiple of `lane_pad`).
    """
    w1n, b1n, w2n, b2n = nutr_params
    w1i, b1i, w2i, b2i = ingr_params
    D = w1n.shape[0]
    n_nutr = w2n.shape[1]
    n_ingr = w2i.shape[1]
    out = n_nutr + n_ingr
    out_pad = _round_up(out, lane_pad)
    dtype = w1n.dtype

    w1cat = jnp.concatenate([w1n, w1i], axis=1)            # [D, 2D]
    b1cat = jnp.concatenate([b1n, b1i], axis=1)            # [1, 2D]

    w2bd = jnp.zeros((2 * D, out_pad), dtype)               # block-diagonal, padded
    w2bd = w2bd.at[:D, :n_nutr].set(w2n)
    w2bd = w2bd.at[D:, n_nutr:out].set(w2i)

    b2cat = jnp.zeros((1, out_pad), dtype)
    b2cat = b2cat.at[:, :n_nutr].set(b2n)
    b2cat = b2cat.at[:, n_nutr:out].set(b2i)

    return (w1cat, b1cat, w2bd, b2cat), (n_nutr, n_ingr)


def fused_mlp_decoders(x, fused_params, *, batch_tile=None):
    """Single Pallas call computing both decoder heads.

    x: [B, D]; returns [B, O_pad] (lane-dense, padded; caller slices heads out).
    """
    w1, b1, w2, b2 = fused_params
    B, D = x.shape
    H = w1.shape[1]          # 2*D
    O = w2.shape[1]          # padded output width (multiple of 128)

    # Pad batch to full sublanes; tile it over a parallel grid axis (2 TCs on v7x).
    B_pad = _round_up(B, 8)
    if batch_tile is None:
        batch_tile = min(B_pad, 128)
    B_pad = _round_up(B_pad, batch_tile)
    nb = B_pad // batch_tile
    if B_pad != B:
        x = jnp.pad(x, ((0, B_pad - B), (0, 0)))

    itemsize = jnp.dtype(x.dtype).itemsize
    cost = pl.CostEstimate(
        flops=2 * B_pad * D * H + 2 * B_pad * H * O,
        transcendentals=0,
        bytes_accessed=(x.size + w1.size + b1.size + w2.size + b2.size
                        + B_pad * O) * itemsize,
    )

    out = pl.pallas_call(
        _fused_decoder_kernel,
        out_shape=jax.ShapeDtypeStruct((B_pad, O), x.dtype),
        grid=(nb,),
        in_specs=[
            pl.BlockSpec((batch_tile, D), lambda i: (i, 0)),
            pl.BlockSpec((D, H), lambda i: (0, 0)),
            pl.BlockSpec((1, H), lambda i: (0, 0)),
            pl.BlockSpec((H, O), lambda i: (0, 0)),
            pl.BlockSpec((1, O), lambda i: (0, 0)),
        ],
        out_specs=pl.BlockSpec((batch_tile, O), lambda i: (i, 0)),
        compiler_params=pltpu.CompilerParams(
            dimension_semantics=("parallel",)),
        cost_estimate=cost,
    )(x, w1, b1, w2, b2)
    return out[:B]


def init_decoder_params(key, d_in, d_out, dtype=jnp.float32):
    """Deterministic init of Linear(d_in,d_in) -> ReLU -> Linear(d_in,d_out)."""
    k1, k2, k3, k4 = jax.random.split(key, 4)
    scale = 1.0 / jnp.sqrt(d_in)
    w1 = jax.random.uniform(k1, (d_in, d_in), dtype, -scale, scale)
    b1 = jax.random.uniform(k2, (1, d_in), dtype, -scale, scale)
    w2 = jax.random.uniform(k3, (d_in, d_out), dtype, -scale, scale)
    b2 = jax.random.uniform(k4, (1, d_out), dtype, -scale, scale)
    return w1, b1, w2, b2


def nutr_car_direct_ingredient_forward(img_emb, fused_params, head_sizes):
    """JAX/Pallas analogue of NutrCarDirectIngredient.forward.

    img_emb stands in for outs['embs']['img'] produced by Car.forward_features.
    """
    n_nutr, n_ingr = head_sizes
    dec = fused_mlp_decoders(img_emb, fused_params)
    outs = {}
    outs["embs"] = {"img": img_emb}
    outs["nutr"] = dec[:, :n_nutr]
    outs["ingrs"] = dec[:, n_nutr:n_nutr + n_ingr]
    return outs


def _ref_decoder(x, w1, b1, w2, b2):
    h = jnp.maximum(x @ w1 + b1, 0.0)
    return h @ w2 + b2


if __name__ == "__main__":
    # Small shapes consistent with the module's __init__:
    B = 4             # batch
    output_size = 32  # Car embedding dim / decoder hidden dim
    num_nutrs = 8
    num_ingrs = 24

    key = jax.random.PRNGKey(0)
    k_emb, k_nutr, k_ingr = jax.random.split(key, 3)

    # Stand-in for Car.forward_features(...)['img'] embedding.
    img_emb = jax.random.normal(k_emb, (B, output_size), jnp.float32)

    nutr_params = init_decoder_params(k_nutr, output_size, num_nutrs)
    ingr_params = init_decoder_params(k_ingr, output_size, num_ingrs)

    # One-time parameter fusion (done at setup, not per forward).
    fused_params, head_sizes = fuse_decoder_params(nutr_params, ingr_params)

    outs = nutr_car_direct_ingredient_forward(img_emb, fused_params, head_sizes)
    jax.block_until_ready(outs)

    # Correctness check against plain-JAX reference on the ORIGINAL (unfused) params.
    nutr_ref = _ref_decoder(img_emb, *nutr_params)
    ingr_ref = _ref_decoder(img_emb, *ingr_params)
    assert outs["nutr"].shape == (B, num_nutrs)
    assert outs["ingrs"].shape == (B, num_ingrs)
    assert jnp.allclose(outs["nutr"], nutr_ref, atol=1e-5, rtol=1e-5)
    assert jnp.allclose(outs["ingrs"], ingr_ref, atol=1e-5, rtol=1e-5)

    print("KERNEL_OK")
</pallas_src>

<mosaic_0001>
module attributes {stable_mosaic.version = 11 : i64} {
  func.func @_fused_decoder_kernel(%arg0: i32, %arg1: memref<8x32xf32, #tpu.memory_space<vmem>>, %arg2: memref<32x64xf32, #tpu.memory_space<vmem>>, %arg3: memref<1x64xf32, #tpu.memory_space<vmem>>, %arg4: memref<64x128xf32, #tpu.memory_space<vmem>>, %arg5: memref<1x128xf32, #tpu.memory_space<vmem>>, %arg6: memref<8x128xf32, #tpu.memory_space<vmem>>) attributes {dimension_semantics = [#tpu.dimension_semantics<parallel>], iteration_bounds = array<i64: 1>, scalar_prefetch = 0 : i64, scratch_operands = 0 : i64, tpu.core_type = #tpu.core_type<tc>, window_params = [{transform_indices = @transform_0, window_bounds = array<i64: 8, 32>}, {pipeline_mode = #tpu.pipeline_mode<synchronous>, transform_indices = @transform_1, window_bounds = array<i64: 32, 64>}, {pipeline_mode = #tpu.pipeline_mode<synchronous>, transform_indices = @transform_2, window_bounds = array<i64: 1, 64>}, {pipeline_mode = #tpu.pipeline_mode<synchronous>, transform_indices = @transform_3, window_bounds = array<i64: 64, 128>}, {pipeline_mode = #tpu.pipeline_mode<synchronous>, transform_indices = @transform_4, window_bounds = array<i64: 1, 128>}, {transform_indices = @transform_5, window_bounds = array<i64: 8, 128>}]} {
    %c0 = arith.constant 0 : index
    %c0_0 = arith.constant 0 : index
    %0 = vector.load %arg1[%c0, %c0_0] : memref<8x32xf32, #tpu.memory_space<vmem>>, vector<8x32xf32>
    %c0_1 = arith.constant 0 : index
    %c0_2 = arith.constant 0 : index
    %1 = vector.load %arg2[%c0_1, %c0_2] : memref<32x64xf32, #tpu.memory_space<vmem>>, vector<32x64xf32>
    %cst = arith.constant dense<0.000000e+00> : vector<8x64xf32>
    %2 = tpu.matmul %0, %1, %cst {dimension_numbers = #tpu.dot_dimension_numbers<[1], [0], [0], [1], [0, 0, 1, 1], [], []>} : vector<8x32xf32>, vector<32x64xf32>, vector<8x64xf32> -> vector<8x64xf32>
    %c0_3 = arith.constant 0 : index
    %c0_4 = arith.constant 0 : index
    %3 = vector.load %arg3[%c0_3, %c0_4] : memref<1x64xf32, #tpu.memory_space<vmem>>, vector<1x64xf32>
    %4 = vector.broadcast %3 : vector<1x64xf32> to vector<8x64xf32>
    %5 = arith.addf %2, %4 : vector<8x64xf32>
    %cst_5 = arith.constant 0.000000e+00 : f32
    %6 = vector.broadcast %cst_5 : f32 to vector<8x64xf32>
    %7 = arith.maximumf %5, %6 : vector<8x64xf32>
    %c0_6 = arith.constant 0 : index
    %c0_7 = arith.constant 0 : index
    %8 = vector.load %arg4[%c0_6, %c0_7] : memref<64x128xf32, #tpu.memory_space<vmem>>, vector<64x128xf32>
    %cst_8 = arith.constant dense<0.000000e+00> : vector<8x128xf32>
    %9 = tpu.matmul %7, %8, %cst_8 {dimension_numbers = #tpu.dot_dimension_numbers<[1], [0], [0], [1], [0, 0, 1, 1], [], []>} : vector<8x64xf32>, vector<64x128xf32>, vector<8x128xf32> -> vector<8x128xf32>
    %c0_9 = arith.constant 0 : index
    %c0_10 = arith.constant 0 : index
    %10 = vector.load %arg5[%c0_9, %c0_10] : memref<1x128xf32, #tpu.memory_space<vmem>>, vector<1x128xf32>
    %11 = vector.broadcast %10 : vector<1x128xf32> to vector<8x128xf32>
    %12 = arith.addf %9, %11 : vector<8x128xf32>
    %c0_11 = arith.constant 0 : index
    %c0_12 = arith.constant 0 : index
    %13 = vector.load %arg6[%c0_11, %c0_12] : memref<8x128xf32, #tpu.memory_space<vmem>>, vector<8x128xf32>
    tpu.vector_store %arg6[%c0_11, %c0_12], %12 {strides = array<i32>} : memref<8x128xf32, #tpu.memory_space<vmem>>, vector<8x128xf32>,
    return
  }
  func.func @transform_0(%arg0: i32) -> (i32, i32) {
    %c0_i32 = arith.constant 0 : i32
    %c0_i32_0 = arith.constant 0 : i32
    return %arg0, %c0_i32 : i32, i32
  }
  func.func @transform_1(%arg0: i32) -> (i32, i32) {
    %c0_i32 = arith.constant 0 : i32
    %c0_i32_0 = arith.constant 0 : i32
    %c0_i32_1 = arith.constant 0 : i32
    return %c0_i32, %c0_i32_0 : i32, i32
  }
  func.func @transform_2(%arg0: i32) -> (i32, i32) {
    %c0_i32 = arith.constant 0 : i32
    %c0_i32_0 = arith.constant 0 : i32
    %c0_i32_1 = arith.constant 0 : i32
    return %c0_i32, %c0_i32_0 : i32, i32
  }
  func.func @transform_3(%arg0: i32) -> (i32, i32) {
    %c0_i32 = arith.constant 0 : i32
    %c0_i32_0 = arith.constant 0 : i32
    %c0_i32_1 = arith.constant 0 : i32
    return %c0_i32, %c0_i32_0 : i32, i32
  }
  func.func @transform_4(%arg0: i32) -> (i32, i32) {
    %c0_i32 = arith.constant 0 : i32
    %c0_i32_0 = arith.constant 0 : i32
    %c0_i32_1 = arith.constant 0 : i32
    return %c0_i32, %c0_i32_0 : i32, i32
  }
  func.func @transform_5(%arg0: i32) -> (i32, i32) {
    %c0_i32 = arith.constant 0 : i32
    %c0_i32_0 = arith.constant 0 : i32
    return %arg0, %c0_i32 : i32, i32
  }
}

</mosaic_0001>

<bundles_post_ra>
// kernel: tpu_custom_call.1
= control target key start
LH: loop header
LB: loop body
LE: loop exit
PB: predicated region body
PF: predicated region fallthrough
CT: control target
= control target key end

     0   :  { %10 = vsyncpa [#allocation3], 0  ;;  %s451_s0 = inlined_call_operand.hbm [shape: f32[8,32], index: 0, kind: input, shape index: {}]   ;;  %s452_s1 = inlined_call_operand.hbm [shape: f32[32,64], index: 1, kind: input, shape index: {}]   ;;  %s453_s2 = inlined_call_operand.vmem [shape: f32[1,64], index: 2, kind: input, shape index: {}]   ;;  %s454_s3 = inlined_call_operand.hbm [shape: f32[64,128], index: 3, kind: input, shape index: {}]   ;;  %s455_s4 = inlined_call_operand.vmem [shape: f32[1,128], index: 4, kind: input, shape index: {}]   ;;  %s456_s5 = inlined_call_operand.hbm [shape: f32[8,128], index: 5, kind: output, shape index: {}]  }
   0x1   :  { %11 = vsyncpa [#allocation6], 0 }
   0x2   :  { %12 = vsyncpa [#allocation4], 0  ;;  %s395_s18 = smov [#allocation5]  }
   0x3   :  { %s28_s19 = sshll.u32 %s395_s18, 4  ;;  %s29_s19 = int_to_ptr.vmem [resolvable:$true] %s28_s19 }
   0x4   :  { %s317_s20 = scalar_lea.vmem %s29_s19, 512  ;;  %p322_p1 = scmp.lt.s32.totalorder %s29_s19, %s29_s19 }
   0x5   :  { %p318_p0 = scmp.ne.s32.totalorder %s29_s19, %s317_s20  ;;  %p323_p2 = scmp.lt.s32.totalorder %s317_s20, %s317_s20 }
   0x7   :  { %p324_p3 = por %p323_p2, %p322_p1 }
   0x9   :  { %p325_p4 = pnand %p324_p3, %p318_p0 }
   0xb   :  { %328 = shalt.err (!%p325_p4)
}
   0xc   :  { %s396_s21 = smov 128   ;;  %s397_s22 = smov 8  }
   0xd   :  { %34 = dma.hbm_to_vmem [thread:$0]  %s452_s1, 512, %s29_s19, [#allocation6], %s396_s21, %s396_s21, %s397_s22  }
   0xe   :  { %s398_s25 = smov [#allocation2]   ;;  %s399_s27 = smov [#allocation7]  }
   0xf   :  { %s19_s26 = sshll.u32 %s398_s25, 4  ;;  %s42_s28 = sshll.u32 %s399_s27, 4  ;;  %s20_s26 = int_to_ptr.vmem [resolvable:$true] %s19_s26  ;;  %s43_s28 = int_to_ptr.vmem [resolvable:$true] %s42_s28 }
  0x10   :  { %s337_s29 = scalar_lea.vmem %s20_s26, 128  ;;  %p342_p6 = scmp.lt.s32.totalorder %s20_s26, %s20_s26 }
  0x11   :  { %p338_p5 = scmp.ne.s32.totalorder %s20_s26, %s337_s29  ;;  %p343_p7 = scmp.lt.s32.totalorder %s337_s29, %s337_s29 }
  0x13   :  { %p344_p8 = por %p343_p7, %p342_p6 }
  0x15   :  { %p345_p9 = pnand %p344_p8, %p338_p5 }
  0x17   :  { %348 = shalt.err (!%p345_p9)
}
  0x18   :  { %22 = dma.hbm_to_vmem [thread:$0]  %s451_s0, 128, %s20_s26, [#allocation3]  }
  0x19   :  { %s357_s7 = scalar_lea.vmem %s43_s28, 1024  ;;  %p362_p11 = scmp.lt.s32.totalorder %s43_s28, %s43_s28 }
  0x1a   :  { %p358_p10 = scmp.ne.s32.totalorder %s43_s28, %s357_s7  ;;  %p363_p12 = scmp.lt.s32.totalorder %s357_s7, %s357_s7 }
  0x1c   :  { %p364_p13 = por %p363_p12, %p362_p11 }
  0x1e   :  { %p365_p0 = pnand %p364_p13, %p358_p10 }
  0x20   :  { %368 = shalt.err (!%p365_p0)
}
  0x21   :  { %48 = dma.hbm_to_vmem [thread:$0]  %s454_s3, 1024, %s43_s28, [#allocation6], %s396_s21, %s396_s21, %s397_s22  }
  0x22   :  { %389 = dma.done.wait [#allocation3], 128  }
  0x23   :  { %390 = vsyncadd [#allocation3], 4294967168 }
  0x24   :  { %391 = dma.done.wait [#allocation6], 1536  }
  0x25   :  { %392 = vsyncadd [#allocation6], 4294965760  ;;  %v400_v0 = vmov 0.0   ;;  %vm401_vm0 = vmmov 0   ;;  %v64_v1 = vld [vmem:[#allocation5 + $0x18] sm:$0xff]  ;;  %v63_v2 = vld [vmem:[#allocation5 + $0x10] sm:$0xff] }
  0x26   :  { %271 = vmatprep.subr.mxu0 %v400_v0  ;;  %279 = vmatprep.mubr.msk.f32.mxu0 %vm401_vm0, %v400_v0  ;;  %v154_v3 = vld [vmem:[#allocation7 + $0x38] sm:$0xff]  ;;  %v62_v4 = vld [vmem:[#allocation5 + $0x8] sm:$0xff]  ;;  %v153_v5 = vld [vmem:[#allocation7 + $0x30] sm:$0xff]  ;;  %vm72_vm1 = vcmask 261120   ;;  %vm162_vm2 = vcmask 523264   ;;  %s402_s11 = smov [#allocation8]  }
  0x27   :  { %282 = vmatprep.subr.mxu1 %v400_v0  ;;  %298 = vmatprep.mubr.msk.f32.mxu1 %vm401_vm0, %v400_v0  ;;  %v152_v6 = vld [vmem:[#allocation7 + $0x28] sm:$0xff]  ;;  %v61_v7 = vld [vmem:[#allocation5] sm:$0xff]  ;;  %v60_v8 = vld [vmem:[#allocation2] sm:$0xff]  ;;  %s243_s12 = sshll.u32 %s402_s11, 4  ;;  %s244_s12 = int_to_ptr.vmem [resolvable:$true] %s243_s12 }
  0x28   :  { %272 = vmatpush3.msra.mxu0 %v64_v1  ;;  %283 = vmatpush3.msra.mxu1 %v154_v3  ;;  %v151_v9 = vld [vmem:[#allocation7 + $0x20] sm:$0xff]  ;;  %v150_v10 = vld [vmem:[#allocation7 + $0x18] sm:$0xff]  ;;  %v149_v11 = vld [vmem:[#allocation7 + $0x10] sm:$0xff]  ;;  %s369_s13 = scalar_lea.vmem %s244_s12, 128  ;;  %p374_p2 = scmp.lt.s32.totalorder %s244_s12, %s244_s12 }
  0x29   :  { %273 = vmatprep.subr.mxu0 %v400_v0  ;;  %284 = vmatprep.subr.mxu1 %v400_v0  ;;  %v148_v12 = vld [vmem:[#allocation7 + $0x8] sm:$0xff]  ;;  %v147_v13 = vld [vmem:[#allocation7] sm:$0xff]  ;;  %v253_v14 = vld [vmem:[%s453_s2] ss:$0 sm:$0xff]  ;;  %p370_p1 = scmp.ne.s32.totalorder %s244_s12, %s369_s13  ;;  %p375_p3 = scmp.lt.s32.totalorder %s369_s13, %s369_s13 }
  0x2a   :  { %274 = vmatpush3.msra.mxu0 %v63_v2  ;;  %285 = vmatpush3.msra.mxu1 %v153_v5  ;;  %v255_v19 = vld [vmem:[%s455_s4] ss:$0 sm:$0xff] }
  0x2b   :  { %275 = vmatprep.subr.mxu0 %v400_v0  ;;  %286 = vmatprep.subr.mxu1 %v400_v0  ;;  %p376_p4 = por %p375_p3, %p374_p2 }
  0x2c   :  { %276 = vmatpush3.msra.mxu0 %v62_v4  ;;  %287 = vmatpush3.msra.mxu1 %v152_v6 }
  0x2d   :  { %277 = vmatprep.subr.mxu0 %v400_v0  ;;  %288 = vmatprep.subr.mxu1 %v400_v0  ;;  %p377_p5 = pnand %p376_p4, %p370_p1 }
  0x2e   :  { %278 = vmatpush3.msra.mxu0 %v61_v7  ;;  %289 = vmatpush3.msra.mxu1 %v151_v9 }
  0x2f   :  { %280 = vmatmul.mubr.msk.f32.vlgmr.msra.gmra.mxu0 %vm72_vm1, %v60_v8  ;;  %290 = vmatprep.subr.mxu1 %v400_v0 }
  0x30   :  { %291 = vmatpush3.msra.mxu1 %v150_v10 }
  0x31   :  { %292 = vmatprep.subr.mxu1 %v400_v0 }
  0x32   :  { %293 = vmatpush3.msra.mxu1 %v149_v11 }
  0x33   :  { %294 = vmatprep.subr.mxu1 %v400_v0 }
  0x34   :  { %295 = vmatpush3.msra.mxu1 %v148_v12 }
  0x35   :  { %296 = vmatprep.subr.mxu1 %v400_v0 }
  0x36   :  { %297 = vmatpush3.msra.mxu1 %v147_v13 }
  0xef   :  { %v142_v15 = vpop.f32.mrf.mxu0 }
  0xf0   :  { %v143_v16 = vadd.f32 %v253_v14, %v142_v15 }
  0xf1   :  { %v281_v17 = vpop.f32.mrf.mxu0 }
  0xf2   :  { %v146_v18 = vmax.f32 %v143_v16, 0.0 }
  0xf4   :  { %299 = vmatmul.mubr.msk.f32.vlgmr.msra.gmra.mxu1 %vm162_vm2, %v146_v18 }
 0x1b4   :  { %v232_v20 = vpop.f32.mrf.mxu1 }
 0x1b5   :  { %v233_v21 = vadd.f32 %v255_v19, %v232_v20 }
 0x1b6   :  { %v300_v22 = vpop.f32.mrf.mxu1 }
 0x1b7   :  { %236 = vst [vmem:[#allocation8] sm:$0xff] %v233_v21 }
 0x1b8   :  { %380 = shalt.err (!%p377_p5)
}
 0x1b9   :  { %246 = dma.vmem_to_hbm [thread:$0]  %s244_s12, 128, %s456_s5, [#allocation4]  }
 0x1ba   :  { %393 = dma.done.wait [#allocation4], 128  }
 0x1bb   :  { %394 = vsyncadd [#allocation4], 4294967168 }
 0x1bc   :  { %250 = vsyncpa [#allocation3], 1 }
 0x1bd   :  { %251 = vsyncpa [#allocation6], 1 }
 0x1be   :  { %252 = vsyncpa [#allocation4], 1 }

</bundles_post_ra>
